<compile_context>
chip_gen: v6e
topology: v6e:2x2x1
jax: 0.10.0
libtpu: 0.0.40
codegen_flags: <defaults>
</compile_context>

<pallas_src>
import jax
import jax.numpy as jnp
from jax.experimental import pallas as pl
from jax.experimental.pallas import tpu as pltpu


_VMEM_TILE_BUDGET = 12 * 1024 * 1024  # double-buffered block bytes, safe on all gens


def _round_up(x, m):
    return ((x + m - 1) // m) * m


def _pick_tile(dim, target, align):
    """Largest legal tile <= target: the full dim if dim <= align, otherwise an
    align-multiple (ragged trailing block is handled by the cdiv grid)."""
    if dim <= align:
        return dim
    t = min(target, dim)
    return max(align, (t // align) * align)


def _crowd_kernel(x_ref, w_ref, o_ref):
    # (TM, J) @ (J, TN) on the MXU; f32 accumulation, cast on store.
    x = x_ref[...].astype(w_ref.dtype)
    o_ref[...] = jnp.dot(
        x, w_ref[...], preferred_element_type=jnp.float32
    ).astype(o_ref.dtype)


def make_crowd_weights(output_dim, num_annotators, dtype=jnp.float32):
    """PyTorch init: zeros with weights[k, k, :] = 1 (identity per annotator)."""
    eye = jnp.eye(output_dim, dtype=dtype)
    return jnp.broadcast_to(eye[:, :, None], (output_dim, output_dim, num_annotators))


def prepare_crowd_weights(weights, compute_dtype=jnp.bfloat16):
    """Pack W (K, J, L) -> (J, K*L) and cast.  Do this ONCE, not per forward."""
    K, J, L = weights.shape
    return jnp.transpose(weights, (1, 0, 2)).reshape(J, K * L).astype(compute_dtype)


def crowd_layer_forward_packed(x, w2, output_dim, num_annotators, *,
                               tm=None, tn=None, out_dtype=jnp.bfloat16):
    """x: (N, J); w2: output of prepare_crowd_weights -> out: (N, K, L)."""
    N, J = x.shape
    J2, kl = w2.shape
    assert J == J2, "contraction dims must match"
    assert kl == output_dim * num_annotators, "w2 must come from prepare_crowd_weights"

    # Large, lane-dense tiles; clamp to the problem (mem-bound kernel).
    tm = _pick_tile(N, tm or 512, 8)
    tn = _pick_tile(kl, tn or 2048, 128)

    # Keep double-buffered blocks inside the default scoped-VMEM limits.
    x_b = x.dtype.itemsize
    w_b = w2.dtype.itemsize
    o_b = jnp.dtype(out_dtype).itemsize

    def vmem_bytes(tm_, tn_):
        return 2 * (tm_ * J * x_b + J * tn_ * w_b + tm_ * tn_ * o_b)

    while vmem_bytes(tm, tn) > _VMEM_TILE_BUDGET and (tn > 128 or tm > 8):
        if tn > 128 and (tn >= tm or tm <= 8):
            tn = max(128, (tn // 2 // 128) * 128)
        else:
            tm = max(8, (tm // 2 // 8) * 8)

    # Megacore (v7x has 2 TCs): never leave a core idle on a 1x1 grid.
    if pl.cdiv(N, tm) * pl.cdiv(kl, tn) == 1 and N > 16:
        tm = _round_up(pl.cdiv(N, 2), 8)

    grid = (pl.cdiv(N, tm), pl.cdiv(kl, tn))
    gi, gj = grid

    # Advisory cost reflecting actual traffic: x is resident across the K*L axis
    # (one fetch per N tile); weight strips are re-fetched per N tile unless a
    # single strip covers K*L (then they are resident for the whole grid).
    w_fetches = 1 if gj == 1 else gi * gj
    cost = pl.CostEstimate(
        flops=2 * gi * tm * J * gj * tn,
        transcendentals=0,
        bytes_accessed=(gi * tm * J * x_b
                        + w_fetches * J * tn * w_b
                        + gi * gj * tm * tn * o_b),
    )

    out = pl.pallas_call(
        _crowd_kernel,
        out_shape=jax.ShapeDtypeStruct((N, kl), out_dtype),
        grid=grid,
        in_specs=[
            pl.BlockSpec((tm, J), lambda i, j: (i, 0)),   # resident across j
            pl.BlockSpec((J, tn), lambda i, j: (0, j)),   # resident across i if gj==1
        ],
        out_specs=pl.BlockSpec((tm, tn), lambda i, j: (i, j)),
        compiler_params=pltpu.CompilerParams(
            dimension_semantics=("parallel", "parallel")),
        cost_estimate=cost,
    )(x, w2)

    # (N, K*L) -> (N, K, L) is a free row-major reshape (no slicing, no copy).
    return out.reshape(N, output_dim, num_annotators)


def crowd_layer_forward(x, weights, *, compute_dtype=jnp.bfloat16, **kw):
    """One-shot convenience (re-packs weights each call; prefer packing once)."""
    K, _, L = weights.shape
    w2 = prepare_crowd_weights(weights, compute_dtype=compute_dtype)
    return crowd_layer_forward_packed(x, w2, K, L, **kw)


if __name__ == "__main__":
    key = jax.random.PRNGKey(0)
    kx, kw, kx2, kw2 = jax.random.split(key, 4)

    def ref_f32(xv, wv):
        return jnp.einsum("ij,kjl->ikl", xv.astype(jnp.float32),
                          wv.astype(jnp.float32),
                          precision=jax.lax.Precision.HIGHEST)

    def ref_bf16(xv, wv):
        return ref_f32(xv.astype(jnp.bfloat16), wv.astype(jnp.bfloat16))

    # (a) Module-default weights (identity confusion matrices), default bf16 path.
    batch, output_dim, num_annotators = 8, 16, 4
    x = jax.random.normal(kx, (batch, output_dim), dtype=jnp.float32)
    w_init = make_crowd_weights(output_dim, num_annotators)
    out_a = jax.block_until_ready(crowd_layer_forward(x, w_init))
    assert out_a.shape == (batch, output_dim, num_annotators), out_a.shape
    assert jnp.allclose(out_a.astype(jnp.float32), ref_f32(x, w_init),
                        atol=3e-2, rtol=3e-2)

    # (b) Random weights, pre-packed bf16 weights, f32 output requested.
    w_rand = jax.random.normal(
        kw, (output_dim, output_dim, num_annotators), dtype=jnp.float32)
    w2_rand = prepare_crowd_weights(w_rand)
    out_b = jax.block_until_ready(
        crowd_layer_forward_packed(x, w2_rand, output_dim, num_annotators,
                                   out_dtype=jnp.float32))
    assert jnp.allclose(out_b, ref_bf16(x, w_rand), atol=5e-3, rtol=5e-3)

    # (c) Multi-tile grid with ragged edges: N=300 (not /8), K*L=192 (not /128),
    #     f32 compute path for tight parity with the PyTorch f32 einsum.
    batch_c, ann_c = 300, 12
    x_c = jax.random.normal(kx2, (batch_c, output_dim), dtype=jnp.float32)
    w_c = jax.random.normal(
        kw2, (output_dim, output_dim, ann_c), dtype=jnp.float32)
    w2_c = prepare_crowd_weights(w_c, compute_dtype=jnp.float32)
    out_c = jax.block_until_ready(
        crowd_layer_forward_packed(x_c, w2_c, output_dim, ann_c,
                                   tm=64, tn=128, out_dtype=jnp.float32))
    assert out_c.shape == (batch_c, output_dim, ann_c), out_c.shape
    assert jnp.allclose(out_c, ref_f32(x_c, w_c), atol=1e-2, rtol=1e-2)

    print("KERNEL_OK")
</pallas_src>

<mosaic_0001>
module attributes {stable_mosaic.version = 11 : i64} {
  func.func @_crowd_kernel(%arg0: i32, %arg1: i32, %arg2: memref<8x16xf32, #tpu.memory_space<vmem>>, %arg3: memref<16x64xbf16, #tpu.memory_space<vmem>>, %arg4: memref<8x64xbf16, #tpu.memory_space<vmem>>) attributes {dimension_semantics = [#tpu.dimension_semantics<parallel>, #tpu.dimension_semantics<parallel>], iteration_bounds = array<i64: 1, 1>, scalar_prefetch = 0 : i64, scratch_operands = 0 : i64, tpu.core_type = #tpu.core_type<tc>, window_params = [{transform_indices = @transform_0, window_bounds = array<i64: 8, 16>}, {transform_indices = @transform_1, window_bounds = array<i64: 16, 64>}, {transform_indices = @transform_2, window_bounds = array<i64: 8, 64>}]} {
    %c0 = arith.constant 0 : index
    %c0_0 = arith.constant 0 : index
    %0 = vector.load %arg2[%c0, %c0_0] : memref<8x16xf32, #tpu.memory_space<vmem>>, vector<8x16xf32>
    %1 = arith.truncf %0 : vector<8x16xf32> to vector<8x16xbf16>
    %c0_1 = arith.constant 0 : index
    %c0_2 = arith.constant 0 : index
    %2 = vector.load %arg3[%c0_1, %c0_2] : memref<16x64xbf16, #tpu.memory_space<vmem>>, vector<16x64xbf16>
    %cst = arith.constant dense<0.000000e+00> : vector<8x64xf32>
    %3 = tpu.matmul %1, %2, %cst {dimension_numbers = #tpu.dot_dimension_numbers<[1], [0], [0], [1], [0, 0, 1, 1], [], []>} : vector<8x16xbf16>, vector<16x64xbf16>, vector<8x64xf32> -> vector<8x64xf32>
    %4 = arith.truncf %3 : vector<8x64xf32> to vector<8x64xbf16>
    %c0_3 = arith.constant 0 : index
    %c0_4 = arith.constant 0 : index
    %5 = vector.load %arg4[%c0_3, %c0_4] : memref<8x64xbf16, #tpu.memory_space<vmem>>, vector<8x64xbf16>
    tpu.vector_store %arg4[%c0_3, %c0_4], %4 {strides = array<i32>} : memref<8x64xbf16, #tpu.memory_space<vmem>>, vector<8x64xbf16>,
    return
  }
  func.func @transform_0(%arg0: i32, %arg1: i32) -> (i32, i32) {
    %c0_i32 = arith.constant 0 : i32
    %c0_i32_0 = arith.constant 0 : i32
    return %arg0, %c0_i32 : i32, i32
  }
  func.func @transform_1(%arg0: i32, %arg1: i32) -> (i32, i32) {
    %c0_i32 = arith.constant 0 : i32
    %c0_i32_0 = arith.constant 0 : i32
    return %c0_i32, %arg1 : i32, i32
  }
  func.func @transform_2(%arg0: i32, %arg1: i32) -> (i32, i32) {
    %c0_i32 = arith.constant 0 : i32
    return %arg0, %arg1 : i32, i32
  }
}

</mosaic_0001>

<bundles_post_ra>
// kernel: tpu_custom_call.1
= control target key start
LH: loop header
LB: loop body
LE: loop exit
PB: predicated region body
PF: predicated region fallthrough
CT: control target
= control target key end

     0   :  { %7 = vsyncpa [#allocation3], 0  ;;  %s227_s0 = inlined_call_operand.hbm [shape: f32[8,16], index: 0, kind: input, shape index: {}]   ;;  %s228_s1 = inlined_call_operand.hbm [shape: bf16[16,64], index: 1, kind: input, shape index: {}]   ;;  %s229_s2 = inlined_call_operand.hbm [shape: bf16[8,64], index: 2, kind: output, shape index: {}]  }
   0x1   :  { %8 = vsyncpa [#allocation6], 0 }
   0x2   :  { %9 = vsyncpa [#allocation4], 0  ;;  %s196_s9 = smov [#allocation2]   ;;  %s197_s11 = smov [#allocation5]  }
   0x3   :  { %s16_s10 = sshll.u32 %s196_s9, 4  ;;  %s25_s12 = sshll.u32 %s197_s11, 4  ;;  %s17_s10 = int_to_ptr.vmem [resolvable:$true] %s16_s10  ;;  %s26_s12 = int_to_ptr.vmem [resolvable:$true] %s25_s12 }
   0x4   :  { %s138_s13 = scalar_lea.vmem %s17_s10, 128  ;;  %p143_p1 = scmp.lt.s32.totalorder %s17_s10, %s17_s10 }
   0x5   :  { %p139_p0 = scmp.ne.s32.totalorder %s17_s10, %s138_s13  ;;  %p144_p2 = scmp.lt.s32.totalorder %s138_s13, %s138_s13 }
   0x7   :  { %p145_p3 = por %p144_p2, %p143_p1 }
   0x9   :  { %p146_p4 = pnand %p145_p3, %p139_p0 }
   0xb   :  { %149 = shalt.err (!%p146_p4)
}
   0xc   :  { %19 = dma.hbm_to_vmem [thread:$0]  %s227_s0, 128, %s17_s10, [#allocation3]  }
   0xd   :  { %s158_s16 = scalar_lea.vmem %s26_s12, 128  ;;  %p163_p6 = scmp.lt.s32.totalorder %s26_s12, %s26_s12 }
   0xe   :  { %p159_p5 = scmp.ne.s32.totalorder %s26_s12, %s158_s16  ;;  %p164_p7 = scmp.lt.s32.totalorder %s158_s16, %s158_s16 }
  0x10   :  { %p165_p8 = por %p164_p7, %p163_p6 }
  0x12   :  { %p166_p9 = pnand %p165_p8, %p159_p5 }
  0x14   :  { %169 = shalt.err (!%p166_p9)
}
  0x15   :  { %s198_s17 = smov 64   ;;  %s199_s18 = smov 4  }
  0x16   :  { %31 = dma.hbm_to_vmem [thread:$0]  %s228_s1, 128, %s26_s12, [#allocation6], %s198_s17, %s198_s17, %s199_s18  }
  0x17   :  { %190 = dma.done.wait [#allocation3], 128  }
  0x18   :  { %191 = vsyncadd [#allocation3], 4294967168 }
  0x19   :  { %192 = dma.done.wait [#allocation6], 128  }
  0x1a   :  { %193 = vsyncadd [#allocation6], 4294967168  ;;  %v200_v0 = vmov 0.0   ;;  %vm201_vm0 = vmmov 0   ;;  %v129_v1 = vld [vmem:[#allocation5] sm:$0xff]   ;;  %v39_v2 = vld [vmem:[#allocation2] sm:$0xff] }
  0x1b   :  { %116 = vmatprep.subr.bf16.mxu0 %v200_v0  ;;  %118 = vmatprep.mubr.msk.bf16.mxu0 %vm201_vm0, %v200_v0  ;;  %v40_v3 = vpack.c.bf16 %v39_v2, %v39_v2  ;;  %vm49_vm1 = vcmask 130048   ;;  %s202_s0 = smov [#allocation7]   ;;  %vm94_vm2 = vcmask 519168  }
  0x1c   :  { %117 = vmatpush3.bf16.msra.mxu0 %v129_v1  ;;  %s102_s21 = sshll.u32 %s202_s0, 4  ;;  %s103_s21 = int_to_ptr.vmem [resolvable:$true] %s102_s21 }
  0x1d   :  { %s170_s1 = scalar_lea.vmem %s103_s21, 64  ;;  %p175_p11 = scmp.lt.s32.totalorder %s103_s21, %s103_s21 }
  0x1e   :  { %p171_p10 = scmp.ne.s32.totalorder %s103_s21, %s170_s1  ;;  %p176_p12 = scmp.lt.s32.totalorder %s170_s1, %s170_s1 }
  0x1f   :  { %119 = vmatmul.mubr.msk.bf16.vlgmr.msra.gmra.mxu0 %vm49_vm1, %v40_v3 }
  0x20   :  { %p177_p13 = por %p176_p12, %p175_p11 }
  0x22   :  { %p178_p0 = pnand %p177_p13, %p171_p10 }
  0xdf   :  { %v87_v4 = vpop.f32.mrf.mxu0 }
  0xe0   :  { %v93_v5 = vpack.c.bf16 %v87_v4, %v87_v4 }
  0xe1   :  { %v120_v6 = vpop.f32.mrf.mxu0 }
  0xe2   :  { %95 = vst.msk [vmem:[#allocation7] sm:$0xf] %vm94_vm2, %v93_v5 }
  0xe3   :  { %v90_v7 = vpop.f32.mrf.mxu0 }
  0xe4   :  { %181 = shalt.err (!%p178_p0)
}
  0xe5   :  { %105 = dma.vmem_to_hbm [thread:$0]  %s103_s21, 64, %s229_s2, [#allocation4]   ;;  %v121_v8 = vpop.f32.mrf.mxu0 }
  0xe6   :  { %194 = dma.done.wait [#allocation4], 64  }
  0xe7   :  { %195 = vsyncadd [#allocation4], 4294967232 }
  0xe8   :  { %109 = vsyncpa [#allocation3], 1 }
  0xe9   :  { %110 = vsyncpa [#allocation6], 1 }
  0xea   :  { %111 = vsyncpa [#allocation4], 1 }

</bundles_post_ra>
